<compile_context>
chip_gen: v7x
topology: tpu7x:2x2x1
jax: 0.10.0
libtpu: 0.0.40
codegen_flags: <defaults>
</compile_context>

<pallas_src>
import functools

import numpy as np
import jax
import jax.numpy as jnp
from jax.experimental import pallas as pl
from jax.experimental.pallas import tpu as pltpu

EPS = 1e-6                      # timm/MAE LayerNorm eps
_VMEM_LIMIT = 48 * 1024 * 1024  # safe on v5e/v6e/v7x (v7x has 64 MiB physical)
_NEG_INF = -1e9                 # key-pad mask bias (finite -> no NaN rows)


# ----------------------------------------------------------------------------
# GELU (PyTorch nn.GELU default is exact erf-GELU).
# ----------------------------------------------------------------------------
def _gelu_exact(x):
    return 0.5 * x * (1.0 + jax.lax.erf(x * 0.7071067811865476))


def _gelu_tanh(x):
    return jax.nn.gelu(x, approximate=True)


def _probe_erf():
    """Check whether lax.erf lowers through Mosaic on this backend."""
    def k(x_ref, o_ref):
        o_ref[...] = jax.lax.erf(x_ref[...])
    try:
        jax.block_until_ready(
            pl.pallas_call(
                k, out_shape=jax.ShapeDtypeStruct((8, 128), jnp.float32)
            )(jnp.zeros((8, 128), jnp.float32))
        )
        return True
    except Exception:
        return False


def _round_up(v, m):
    return (v + m - 1) // m * m


# ----------------------------------------------------------------------------
# Pallas kernels
# ----------------------------------------------------------------------------
def _layernorm(x, gamma, beta):
    mean = jnp.mean(x, axis=-1, keepdims=True)
    var = jnp.mean((x - mean) ** 2, axis=-1, keepdims=True)
    return (x - mean) * jax.lax.rsqrt(var + EPS) * gamma + beta


def _patch_embed_kernel(x_ref, w_ref, b_ref, pos_ref, o_ref):
    # (tl, K) bf16 @ (K, D) bf16 -> (tl, D) f32, + bias + patch pos_embed.
    o_ref[0] = (
        jnp.dot(x_ref[0], w_ref[...], preferred_element_type=jnp.float32)
        + b_ref[...] + pos_ref[0]
    )


def _fused_blocks_kernel(num_heads, gelu_fn,
                         x_ref, kbias_ref,
                         g1_ref, b1_ref, wqkv_ref, bqkv_ref,
                         wproj_ref, bproj_ref, g2_ref, b2_ref,
                         w1_ref, bm1_ref, w2_ref, bm2_ref,
                         ng_ref, nb_ref, o_ref, act_ref, ctx_ref):
    """All `depth` transformer blocks + final LN for one batch tile.

    grid = (B//Bt, depth); the activation stays resident in `act_ref` (VMEM)
    across the depth axis; stacked per-layer weights arrive via BlockSpec and
    are amortized over the Bt samples of the tile.
    """
    d = pl.program_id(1)

    @pl.when(d == 0)
    def _():
        act_ref[...] = x_ref[...]

    Bt, Np, D = act_ref.shape
    dh = D // num_heads
    kbias = kbias_ref[...]                          # (1, Np) f32, 0 / -1e9

    x2 = act_ref[...].reshape(Bt * Np, D)           # f32 residual stream

    # ---- attention branch (pre-LN) ----
    h = _layernorm(x2, g1_ref[0], b1_ref[0]).astype(jnp.bfloat16)
    qkv = (jnp.dot(h, wqkv_ref[0], preferred_element_type=jnp.float32)
           + bqkv_ref[0])                           # (Bt*Np, 3D); q pre-scaled
    qkv = qkv.astype(jnp.bfloat16).reshape(Bt, Np, 3 * D)

    # TODO(synk): for very large head counts convert this unrolled loop to a
    # lax.fori_loop over a qkv VMEM scratch to bound vreg live ranges.
    for hd in range(num_heads):
        q = qkv[:, :, hd * dh:(hd + 1) * dh]                    # (Bt,Np,dh) bf16
        k = qkv[:, :, D + hd * dh:D + (hd + 1) * dh]
        v = qkv[:, :, 2 * D + hd * dh:2 * D + (hd + 1) * dh]
        s = jnp.einsum('bqd,bkd->bqk', q, k,
                       preferred_element_type=jnp.float32)      # (Bt,Np,Np)
        s = s + kbias                               # mask padded key columns
        s = s - jnp.max(s, axis=-1, keepdims=True)
        p = jnp.exp(s)
        p = (p / jnp.sum(p, axis=-1, keepdims=True)).astype(jnp.bfloat16)
        ctx = jnp.einsum('bqk,bkd->bqd', p, v,
                         preferred_element_type=jnp.float32)    # (Bt,Np,dh)
        ctx_ref[:, hd * dh:(hd + 1) * dh] = (
            ctx.reshape(Bt * Np, dh).astype(jnp.bfloat16))

    attn = (jnp.dot(ctx_ref[...], wproj_ref[0],
                    preferred_element_type=jnp.float32) + bproj_ref[0])
    x2 = x2 + attn

    # ---- MLP branch (pre-LN) ----
    h2 = _layernorm(x2, g2_ref[0], b2_ref[0]).astype(jnp.bfloat16)
    hid = (jnp.dot(h2, w1_ref[0], preferred_element_type=jnp.float32)
           + bm1_ref[0])
    hid = gelu_fn(hid).astype(jnp.bfloat16)
    mlp = (jnp.dot(hid, w2_ref[0], preferred_element_type=jnp.float32)
           + bm2_ref[0])
    x2 = x2 + mlp

    act_ref[...] = x2.reshape(Bt, Np, D)

    @pl.when(d == pl.num_programs(1) - 1)
    def _():
        o_ref[...] = _layernorm(x2, ng_ref[...], nb_ref[...]).reshape(Bt, Np, D)


# ----------------------------------------------------------------------------
# Wrappers calling pallas_call
# ----------------------------------------------------------------------------
def _pick_batch_tile(B):
    # Prefer amortizing the per-layer weight stream over several samples,
    # while keeping >=2 outer grid steps when possible (v7x megacore).
    cands = [bt for bt in (8, 4, 2, 1) if B % bt == 0]
    for bt in cands:
        if bt >= 2 and B // bt >= 2:
            return bt
    return cands[0]


def patch_embed(patches_bf16, w_bf16, b_f32, pos_f32):
    """patches (B, L, K) bf16 -> (B, L, D) f32 tokens with pos_embed added."""
    B, L, K = patches_bf16.shape
    D = w_bf16.shape[1]
    tl = L if L <= 512 else 256                     # fixed tile + cdiv grid
    nl = pl.cdiv(L, tl)
    return pl.pallas_call(
        _patch_embed_kernel,
        out_shape=jax.ShapeDtypeStruct((B, L, D), jnp.float32),
        grid=(B, nl),
        in_specs=[pl.BlockSpec((1, tl, K), lambda b, j: (b, j, 0)),
                  pl.BlockSpec((K, D), lambda b, j: (0, 0)),
                  pl.BlockSpec((1, D), lambda b, j: (0, 0)),
                  pl.BlockSpec((1, tl, D), lambda b, j: (0, j, 0))],
        out_specs=pl.BlockSpec((1, tl, D), lambda b, j: (b, j, 0)),
        compiler_params=pltpu.CompilerParams(
            dimension_semantics=("parallel", "parallel"),
            vmem_limit_bytes=_VMEM_LIMIT),
    )(patches_bf16, w_bf16, b_f32, pos_f32)


def run_encoder(x, key_bias, prep, num_heads, gelu_fn):
    """x: (B, Np, D) f32 padded tokens; key_bias: (1, Np) f32 pad mask bias."""
    B, Np, D = x.shape
    depth = prep['wqkv'].shape[0]
    Bt = _pick_batch_tile(B)

    names = ['g1', 'b1', 'wqkv', 'bqkv', 'wproj', 'bproj',
             'g2', 'b2', 'w1', 'bm1', 'w2', 'bm2']
    weights = [prep[n] for n in names]

    in_specs = [pl.BlockSpec((Bt, Np, D), lambda b, d: (b, 0, 0)),
                pl.BlockSpec((1, Np), lambda b, d: (0, 0))]
    for w in weights:
        nd = w.ndim
        in_specs.append(
            pl.BlockSpec((1,) + w.shape[1:],
                         lambda b, d, _nd=nd: (d,) + (0,) * (_nd - 1)))
    in_specs += [pl.BlockSpec(prep['norm_g'].shape, lambda b, d: (0, 0)),
                 pl.BlockSpec(prep['norm_b'].shape, lambda b, d: (0, 0))]

    return pl.pallas_call(
        functools.partial(_fused_blocks_kernel, num_heads, gelu_fn),
        out_shape=jax.ShapeDtypeStruct((B, Np, D), jnp.float32),
        grid=(B // Bt, depth),
        in_specs=in_specs,
        out_specs=pl.BlockSpec((Bt, Np, D), lambda b, d: (b, 0, 0)),
        scratch_shapes=[pltpu.VMEM((Bt, Np, D), jnp.float32),
                        pltpu.VMEM((Bt * Np, D), jnp.bfloat16)],
        compiler_params=pltpu.CompilerParams(
            dimension_semantics=("parallel", "arbitrary"),
            vmem_limit_bytes=_VMEM_LIMIT),
    )(x, key_bias, *weights, prep['norm_g'], prep['norm_b'])


def prithvi_encoder_forward(x, prep, patch_size, num_heads, gelu_fn):
    """x: (B, C, H, W) NCHW float32. Returns (B, 1 + L, D) float32."""
    B, C, H, W = x.shape
    p = patch_size
    Gh, Gw = H // p, W // p
    L = Gh * Gw                          # num_frames=1, tubelet_size=1
    D = prep['patch_w'].shape[1]

    # Conv3d(kernel=(1,p,p), stride=(1,p,p)) as a per-patch matmul; patch
    # pos_embed is folded into the patch-embed kernel.
    patches = (x.reshape(B, C, Gh, p, Gw, p)
                 .transpose(0, 2, 4, 1, 3, 5)
                 .reshape(B, L, C * p * p)).astype(jnp.bfloat16)
    tok = patch_embed(patches, prep['patch_w'], prep['patch_b'],
                      prep['pos_embed'][:, 1:, :])        # (B, L, D) f32

    # mask_ratio == 0.0: random_masking keeps every token -> identity.
    cls = jnp.broadcast_to(
        prep['cls_token'] + prep['pos_embed'][:, :1, :], (B, 1, D))
    xs = jnp.concatenate([cls, tok], axis=1)              # (B, N, D)
    N = 1 + L

    # Pad the token axis to a multiple of 8; mask padded keys in softmax.
    Np = _round_up(N, 8)
    if Np != N:
        xs = jnp.pad(xs, ((0, 0), (0, Np - N), (0, 0)))
    key_bias = jnp.where(jnp.arange(Np) < N, 0.0, _NEG_INF)
    key_bias = key_bias.astype(jnp.float32).reshape(1, Np)

    out = run_encoder(xs, key_bias, prep, num_heads, gelu_fn)
    # PyTorch `.squeeze(dim=2)` is a no-op (D > 1); drop token padding.
    return out[:, :N, :]


# ----------------------------------------------------------------------------
# Deterministic parameter init (synthetic weights, no checkpoint)
# ----------------------------------------------------------------------------
def init_params(key, in_chans, patch_size, embed_dim, depth, num_heads,
                mlp_ratio, num_patches):
    K = in_chans * patch_size * patch_size       # tubelet_size = 1
    hid = embed_dim * mlp_ratio
    keys = jax.random.split(key, 3 + depth)

    def nrm(k, shape, scale=0.02):
        return (scale * jax.random.normal(k, shape)).astype(jnp.float32)

    params = {
        'patch_w': nrm(keys[0], (K, embed_dim)),   # flattened Conv3d weight
        'patch_b': jnp.zeros((1, embed_dim), jnp.float32),
        'pos_embed': nrm(keys[1], (1, 1 + num_patches, embed_dim)),
        'cls_token': nrm(keys[2], (1, 1, embed_dim)),
        'norm_g': jnp.ones((1, embed_dim), jnp.float32),
        'norm_b': jnp.zeros((1, embed_dim), jnp.float32),
    }
    blocks = []
    for d in range(depth):
        bk = jax.random.split(keys[3 + d], 4)
        blocks.append(dict(
            g1=jnp.ones((1, embed_dim), jnp.float32),
            b1=jnp.zeros((1, embed_dim), jnp.float32),
            wqkv=nrm(bk[0], (embed_dim, 3 * embed_dim)),
            bqkv=jnp.zeros((1, 3 * embed_dim), jnp.float32),
            wproj=nrm(bk[1], (embed_dim, embed_dim)),
            bproj=jnp.zeros((1, embed_dim), jnp.float32),
            g2=jnp.ones((1, embed_dim), jnp.float32),
            b2=jnp.zeros((1, embed_dim), jnp.float32),
            w1=nrm(bk[2], (embed_dim, hid)),
            bm1=jnp.zeros((1, hid), jnp.float32),
            w2=nrm(bk[3], (hid, embed_dim)),
            bm2=jnp.zeros((1, embed_dim), jnp.float32),
        ))
    params['blocks'] = blocks
    return params


def prepare_params(raw, num_heads):
    """Stack per-layer weights on a depth axis, fold 1/sqrt(dh) into the q
    columns of wqkv/bqkv, and cast matmul weights to bf16 (f32 acc in-kernel).
    Biases / LN params / pos-embed stay f32."""
    D = raw['patch_w'].shape[1]
    dh = D // num_heads
    scale = 1.0 / float(np.sqrt(dh))

    def stack(name):
        return jnp.stack([blk[name] for blk in raw['blocks']], axis=0)

    qscale = jnp.concatenate([jnp.full((D,), scale, jnp.float32),
                              jnp.ones((2 * D,), jnp.float32)])
    wqkv = stack('wqkv') * qscale[None, None, :]
    bqkv = stack('bqkv') * qscale[None, None, :]

    return dict(
        patch_w=raw['patch_w'].astype(jnp.bfloat16),
        patch_b=raw['patch_b'],
        pos_embed=raw['pos_embed'],
        cls_token=raw['cls_token'],
        g1=stack('g1'), b1=stack('b1'),
        wqkv=wqkv.astype(jnp.bfloat16), bqkv=bqkv,
        wproj=stack('wproj').astype(jnp.bfloat16), bproj=stack('bproj'),
        g2=stack('g2'), b2=stack('b2'),
        w1=stack('w1').astype(jnp.bfloat16), bm1=stack('bm1'),
        w2=stack('w2').astype(jnp.bfloat16), bm2=stack('bm2'),
        norm_g=raw['norm_g'], norm_b=raw['norm_b'],
    )


# ----------------------------------------------------------------------------
# Pure-JAX reference mirroring the kernel math (same bf16 cast points,
# same f32 accumulations, exact softmax) for the correctness check.
# ----------------------------------------------------------------------------
def ref_forward(x, prep, patch_size, num_heads, gelu_fn):
    B, C, H, W = x.shape
    p = patch_size
    Gh, Gw = H // p, W // p
    D = prep['patch_w'].shape[1]

    patches = (x.reshape(B, C, Gh, p, Gw, p)
                 .transpose(0, 2, 4, 1, 3, 5)
                 .reshape(B, Gh * Gw, C * p * p)).astype(jnp.bfloat16)
    tok = jnp.einsum('blk,kd->bld', patches, prep['patch_w'],
                     preferred_element_type=jnp.float32) + prep['patch_b']
    tok = tok + prep['pos_embed'][:, 1:, :]
    cls = jnp.broadcast_to(prep['cls_token'] + prep['pos_embed'][:, :1, :],
                           (B, 1, D))
    xs = jnp.concatenate([cls, tok], axis=1)

    def ln(y, g, b):
        m = jnp.mean(y, -1, keepdims=True)
        v = jnp.mean((y - m) ** 2, -1, keepdims=True)
        return (y - m) * jax.lax.rsqrt(v + EPS) * g + b

    depth = prep['wqkv'].shape[0]
    dh = D // num_heads
    for d in range(depth):
        h = ln(xs, prep['g1'][d], prep['b1'][d]).astype(jnp.bfloat16)
        qkv = jnp.einsum('bnd,de->bne', h, prep['wqkv'][d],
                         preferred_element_type=jnp.float32) + prep['bqkv'][d]
        qkv = qkv.astype(jnp.bfloat16)
        q, k, v = qkv[..., :D], qkv[..., D:2 * D], qkv[..., 2 * D:]
        qh = q.reshape(B, -1, num_heads, dh).transpose(0, 2, 1, 3)
        kh = k.reshape(B, -1, num_heads, dh).transpose(0, 2, 1, 3)
        vh = v.reshape(B, -1, num_heads, dh).transpose(0, 2, 1, 3)
        s = jnp.einsum('bhqd,bhkd->bhqk', qh, kh,
                       preferred_element_type=jnp.float32)   # q pre-scaled
        s = s - jnp.max(s, axis=-1, keepdims=True)
        pr = jnp.exp(s)
        pr = (pr / jnp.sum(pr, axis=-1, keepdims=True)).astype(jnp.bfloat16)
        o = jnp.einsum('bhqk,bhkd->bhqd', pr, vh,
                       preferred_element_type=jnp.float32)
        o = o.transpose(0, 2, 1, 3).reshape(B, -1, D).astype(jnp.bfloat16)
        o = jnp.einsum('bnd,de->bne', o, prep['wproj'][d],
                       preferred_element_type=jnp.float32) + prep['bproj'][d]
        xs = xs + o
        h2 = ln(xs, prep['g2'][d], prep['b2'][d]).astype(jnp.bfloat16)
        hid = jnp.einsum('bnd,de->bne', h2, prep['w1'][d],
                         preferred_element_type=jnp.float32) + prep['bm1'][d]
        hid = gelu_fn(hid).astype(jnp.bfloat16)
        mlp = jnp.einsum('bne,ed->bnd', hid, prep['w2'][d],
                         preferred_element_type=jnp.float32) + prep['bm2'][d]
        xs = xs + mlp
    return ln(xs, prep['norm_g'], prep['norm_b'])


# ----------------------------------------------------------------------------
if __name__ == "__main__":
    # Small config implied by the module (toy shapes; real Prithvi is D=768+).
    B, C, H, W = 2, 4, 16, 16
    patch_size = 4
    embed_dim = 32
    depth = 2
    num_heads = 4
    mlp_ratio = 4
    num_patches = (H // patch_size) * (W // patch_size)   # L = 16, N = 17

    key = jax.random.PRNGKey(0)
    kx, kp = jax.random.split(key)
    x = jax.random.normal(kx, (B, C, H, W), jnp.float32)
    raw = init_params(kp, C, patch_size, embed_dim, depth, num_heads,
                      mlp_ratio, num_patches)
    prep = prepare_params(raw, num_heads)

    # TODO(synk): exact erf-GELU (PyTorch nn.GELU default); fall back to the
    # tanh approximation only if erf does not lower on this Mosaic build
    # (both kernel and reference use the same gelu_fn, so they stay aligned).
    gelu_fn = _gelu_exact if _probe_erf() else _gelu_tanh

    out = prithvi_encoder_forward(x, prep, patch_size, num_heads, gelu_fn)
    out = jax.block_until_ready(out)
    assert out.shape == (B, 1 + num_patches, embed_dim)

    ref = ref_forward(x, prep, patch_size, num_heads, gelu_fn)
    np.testing.assert_allclose(np.asarray(out), np.asarray(ref),
                               rtol=2e-2, atol=2e-2)
    print("KERNEL_OK")
</pallas_src>

<mosaic_0001>
module attributes {stable_mosaic.version = 11 : i64} {
  func.func @k(%arg0: memref<8x128xf32, #tpu.memory_space<vmem>>, %arg1: memref<8x128xf32, #tpu.memory_space<vmem>>) attributes {dimension_semantics = [], scalar_prefetch = 0 : i64, scratch_operands = 0 : i64, tpu.core_type = #tpu.core_type<tc>} {
    %c0 = arith.constant 0 : index
    %c0_0 = arith.constant 0 : index
    %0 = vector.load %arg0[%c0, %c0_0] : memref<8x128xf32, #tpu.memory_space<vmem>>, vector<8x128xf32>
    %1 = math.erf %0 : vector<8x128xf32>
    %c0_1 = arith.constant 0 : index
    %c0_2 = arith.constant 0 : index
    %2 = vector.load %arg1[%c0_1, %c0_2] : memref<8x128xf32, #tpu.memory_space<vmem>>, vector<8x128xf32>
    tpu.vector_store %arg1[%c0_1, %c0_2], %1 {strides = array<i32>} : memref<8x128xf32, #tpu.memory_space<vmem>>, vector<8x128xf32>,
    return
  }
}

module attributes {stable_mosaic.version = 11 : i64} {
  func.func @_patch_embed_kernel(%arg0: i32, %arg1: i32, %arg2: memref<1x16x64xbf16, #tpu.memory_space<vmem>>, %arg3: memref<64x32xbf16, #tpu.memory_space<vmem>>, %arg4: memref<1x32xf32, #tpu.memory_space<vmem>>, %arg5: memref<1x16x32xf32, #tpu.memory_space<vmem>>, %arg6: memref<1x16x32xf32, #tpu.memory_space<vmem>>) attributes {dimension_semantics = [#tpu.dimension_semantics<parallel>, #tpu.dimension_semantics<parallel>], iteration_bounds = array<i64: 2, 1>, scalar_prefetch = 0 : i64, scratch_operands = 0 : i64, tpu.core_type = #tpu.core_type<tc>, window_params = [{transform_indices = @transform_0, window_bounds = array<i64: 1, 16, 64>}, {pipeline_mode = #tpu.pipeline_mode<synchronous>, transform_indices = @transform_1, window_bounds = array<i64: 64, 32>}, {pipeline_mode = #tpu.pipeline_mode<synchronous>, transform_indices = @transform_2, window_bounds = array<i64: 1, 32>}, {transform_indices = @transform_3, window_bounds = array<i64: 1, 16, 32>}, {transform_indices = @transform_4, window_bounds = array<i64: 1, 16, 32>}]} {
    %c0 = arith.constant 0 : index
    %c0_0 = arith.constant 0 : index
    %c0_1 = arith.constant 0 : index
    %0 = vector.load %arg2[%c0, %c0_0, %c0_1] : memref<1x16x64xbf16, #tpu.memory_space<vmem>>, vector<1x16x64xbf16>
    %1 = vector.shape_cast %0 : vector<1x16x64xbf16> to vector<16x64xbf16>
    %c0_2 = arith.constant 0 : index
    %c0_3 = arith.constant 0 : index
    %2 = vector.load %arg3[%c0_2, %c0_3] : memref<64x32xbf16, #tpu.memory_space<vmem>>, vector<64x32xbf16>
    %cst = arith.constant dense<0.000000e+00> : vector<16x32xf32>
    %3 = tpu.matmul %1, %2, %cst {dimension_numbers = #tpu.dot_dimension_numbers<[1], [0], [0], [1], [0, 0, 1, 1], [], []>} : vector<16x64xbf16>, vector<64x32xbf16>, vector<16x32xf32> -> vector<16x32xf32>
    %c0_4 = arith.constant 0 : index
    %c0_5 = arith.constant 0 : index
    %4 = vector.load %arg4[%c0_4, %c0_5] : memref<1x32xf32, #tpu.memory_space<vmem>>, vector<1x32xf32>
    %5 = vector.broadcast %4 : vector<1x32xf32> to vector<16x32xf32>
    %6 = arith.addf %3, %5 : vector<16x32xf32>
    %c0_6 = arith.constant 0 : index
    %c0_7 = arith.constant 0 : index
    %c0_8 = arith.constant 0 : index
    %7 = vector.load %arg5[%c0_6, %c0_7, %c0_8] : memref<1x16x32xf32, #tpu.memory_space<vmem>>, vector<1x16x32xf32>
    %8 = vector.shape_cast %7 : vector<1x16x32xf32> to vector<16x32xf32>
    %9 = arith.addf %6, %8 : vector<16x32xf32>
    %c0_9 = arith.constant 0 : index
    %c0_10 = arith.constant 0 : index
    %c0_11 = arith.constant 0 : index
    %10 = vector.load %arg6[%c0_9, %c0_10, %c0_11] : memref<1x16x32xf32, #tpu.memory_space<vmem>>, vector<1x16x32xf32>
    %11 = vector.shape_cast %10 : vector<1x16x32xf32> to vector<16x32xf32>
    %12 = vector.shape_cast %9 : vector<16x32xf32> to vector<1x16x32xf32>
    tpu.vector_store %arg6[%c0_9, %c0_10, %c0_11], %12 {strides = array<i32>} : memref<1x16x32xf32, #tpu.memory_space<vmem>>, vector<1x16x32xf32>,
    return
  }
  func.func @transform_0(%arg0: i32, %arg1: i32) -> (i32, i32, i32) {
    %c0_i32 = arith.constant 0 : i32
    %c0_i32_0 = arith.constant 0 : i32
    return %arg0, %arg1, %c0_i32 : i32, i32, i32
  }
  func.func @transform_1(%arg0: i32, %arg1: i32) -> (i32, i32) {
    %c0_i32 = arith.constant 0 : i32
    %c0_i32_0 = arith.constant 0 : i32
    %c0_i32_1 = arith.constant 0 : i32
    return %c0_i32, %c0_i32_0 : i32, i32
  }
  func.func @transform_2(%arg0: i32, %arg1: i32) -> (i32, i32) {
    %c0_i32 = arith.constant 0 : i32
    %c0_i32_0 = arith.constant 0 : i32
    %c0_i32_1 = arith.constant 0 : i32
    return %c0_i32, %c0_i32_0 : i32, i32
  }
  func.func @transform_3(%arg0: i32, %arg1: i32) -> (i32, i32, i32) {
    %c0_i32 = arith.constant 0 : i32
    %c0_i32_0 = arith.constant 0 : i32
    %c0_i32_1 = arith.constant 0 : i32
    return %c0_i32, %arg1, %c0_i32_0 : i32, i32, i32
  }
  func.func @transform_4(%arg0: i32, %arg1: i32) -> (i32, i32, i32) {
    %c0_i32 = arith.constant 0 : i32
    %c0_i32_0 = arith.constant 0 : i32
    return %arg0, %arg1, %c0_i32 : i32, i32, i32
  }
}

</mosaic_0001>

<bundles_post_ra>
// kernel: tpu_custom_call.1
= control target key start
LH: loop header
LB: loop body
LE: loop exit
PB: predicated region body
PF: predicated region fallthrough
CT: control target
= control target key end

     0   :  { %6 = vsyncpa [#allocation3], 0  ;;  %s127_s0 = inlined_call_operand.hbm [shape: f32[8,128], index: 0, kind: input, shape index: {}]   ;;  %s128_s1 = inlined_call_operand.hbm [shape: f32[8,128], index: 1, kind: output, shape index: {}]  }
   0x1   :  { %7 = vsyncpa [#allocation4], 0  ;;  %s91_s6 = smov [#allocation2]   ;;  %s43_s10 = scalar_lea.hbm %s127_s0, 128 }
   0x2   :  { %s14_s7 = sshll.u32 %s91_s6, 4  ;;  %p44_p0 = scmp.ne.s32.totalorder %s127_s0, %s43_s10  ;;  %s15_s7 = int_to_ptr.vmem [resolvable:$true] %s14_s7 }
   0x3   :  { %p47_p1 = scmp.lt.u32.totalorder %s43_s10, %s127_s0 }
   0x5   :  { %p49_p2 = pnand %p47_p1, %p44_p0 }
   0x7   :  { %52 = shalt.err (!%p49_p2)
}
   0x8   :  { %s53_s15 = scalar_lea.vmem %s15_s7, 128  ;;  %p58_p4 = scmp.lt.s32.totalorder %s15_s7, %s15_s7 }
   0x9   :  { %p54_p3 = scmp.ne.s32.totalorder %s15_s7, %s53_s15  ;;  %p59_p5 = scmp.lt.s32.totalorder %s53_s15, %s53_s15 }
   0xb   :  { %p60_p6 = por %p59_p5, %p58_p4 }
   0xd   :  { %p61_p7 = pnand %p60_p6, %p54_p3 }
   0xf   :  { %64 = shalt.err (!%p61_p7)
}
  0x10   :  { %17 = dma.hbm_to_vmem [thread:$0]  %s127_s0, 128, %s15_s7, [#allocation3]  }
  0x11   :  { %87 = dma.done.wait [#allocation3], 128  }
  0x12   :  { %88 = vsyncadd [#allocation3], 4294967168  ;;  %v21_v0 = vld [vmem:[#allocation2] sm:$0xff]  ;;  %s92_s18 = smov [#allocation5]  }
  0x13   :  { %41 = verf.f32 %v21_v0  ;;  %s30_s19 = sshll.u32 %s92_s18, 4  ;;  %s31_s19 = int_to_ptr.vmem [resolvable:$true] %s30_s19 }
  0x14   :  { %s65_s20 = scalar_lea.vmem %s31_s19, 128  ;;  %p70_p9 = scmp.lt.s32.totalorder %s31_s19, %s31_s19 }
  0x15   :  { %p66_p8 = scmp.ne.s32.totalorder %s31_s19, %s65_s20  ;;  %p71_p10 = scmp.lt.s32.totalorder %s65_s20, %s65_s20 }
  0x17   :  { %p72_p11 = por %p71_p10, %p70_p9 }
  0x19   :  { %p73_p12 = pnand %p72_p11, %p66_p8 }
  0x1d   :  { %v42_v1 = vpop.eup %41 }
  0x1e   :  { %23 = vst [vmem:[#allocation5] sm:$0xff] %v42_v1 }
  0x1f   :  { %76 = shalt.err (!%p73_p12)
}
  0x20   :  { %s77_s0 = scalar_lea.hbm %s128_s1, 128 }
  0x21   :  { %p78_p13 = scmp.ne.s32.totalorder %s128_s1, %s77_s0  ;;  %p81_p0 = scmp.lt.u32.totalorder %s77_s0, %s128_s1 }
  0x23   :  { %p83_p1 = pnand %p81_p0, %p78_p13 }
  0x25   :  { %86 = shalt.err (!%p83_p1)
}
  0x26   :  { %33 = dma.vmem_to_hbm [thread:$0]  %s31_s19, 128, %s128_s1, [#allocation4]  }
  0x27   :  { %89 = dma.done.wait [#allocation4], 128  }
  0x28   :  { %90 = vsyncadd [#allocation4], 4294967168 }
  0x29   :  { %37 = vsyncpa [#allocation3], 1 }
  0x2a   :  { %38 = vsyncpa [#allocation4], 1 }

// kernel: tpu_custom_call.1
= control target key start
LH: loop header
LB: loop body
LE: loop exit
PB: predicated region body
PF: predicated region fallthrough
CT: control target
= control target key end

     0   :  { %9 = vsyncpa [#allocation3], 0  ;;  %s808_s0 = inlined_call_operand.vmem [shape: bf16[2,16,64], index: 0, kind: input, shape index: {}]   ;;  %s809_s1 = inlined_call_operand.vmem [shape: bf16[64,32], index: 1, kind: input, shape index: {}]   ;;  %s810_s2 = inlined_call_operand.vmem [shape: f32[1,32], index: 2, kind: input, shape index: {}]   ;;  %s811_s3 = inlined_call_operand.vmem [shape: f32[1,16,32], index: 3, kind: input, shape index: {}]   ;;  %s812_s4 = inlined_call_operand.hbm [shape: f32[2,16,32], index: 4, kind: output, shape index: {}]  }
   0x1   :  { %11 = vsyncpa [#allocation3 + $0x1], 0  ;;  %s672_s15 = smov 0   ;;  %s674_s16 = smov 0  }
   0x2   :  { %s676_s17 = smov 0   ;;  %s678_s18 = smov 0  }
   0x3   :  { %s680_s19 = smov 0   ;;  %s682_s20 = smov 0  }
   0x4 LB: > { %s458_s21 = sadd.s32 4294967295, %s640_s20   ;;  %s459_s22 = sadd.s32 4294967294, %s640_s20   ;;  %s640_s20 = sphi %s682_s20, %s17_s20   ;;  %s636_s19 = sphi %s680_s19, %s819_s19   ;;  %s632_s18 = sphi %s678_s18, %s818_s18   ;;  %s628_s17 = sphi %s676_s17, %s817_s17   ;;  %s624_s16 = sphi %s674_s16, %s816_s16   ;;  %s620_s15 = sphi %s672_s15, %s815_s15  }
   0x5   : > { %s29_s23 = sadd.s32 1, %s636_s19  ;;  %s134_s24 = sadd.s32 1, %s628_s17 }
   0x6   : > { %p31_p0 = scmp.ge.s32.totalorder %s29_s23, 2  ;;  %p144_p1 = scmp.ne.s32.totalorder %s628_s17, %s624_s16 }
   0x7   : > { %p145_p2 = scmp.eq.s32.totalorder %s458_s21, 1  ;;  %p150_p3 = scmp.ne.s32.totalorder %s624_s16, %s620_s15 }
   0x8   : > { %s821_s23 = smov (%p31_p0, %s29_s23), 0  ;;  %p151_p5 = scmp.eq.s32.totalorder %s459_s22, 1 }
   0x9   : > { %p712_p4 = por %p145_p2, %p144_p1  ;;  %s129_s26 = ssub.s32 %s636_s19, %s821_s23 }
   0xa   : > { %p463_p6 = scmp.ge.s32.totalorder %s640_s20, 1  ;;  %p132_p7 = scmp.eq.s32.totalorder %s129_s26, 0 }
   0xb   : > { %p719_p8 = por %p151_p5, %p150_p3  ;;  %p197_p9 = scmp.lt.s32.totalorder %s640_s20, 3 }
   0xc   : > { %s725_s28 = scalar_select %p132_p7, %s628_s17, %s134_s24  }
   0xd   : > { %p198_p10 = pnand %p463_p6, %p197_p9 }
   0xe   : > { %v557_v0 = vld [vmem:[%s809_s1] sm:$0xff] (!%p198_p10)   ;;  %v642_v1 = vmov (!%p198_p10), 0.0   ;;  %v558_v2 = vld [vmem:[%s809_s1 + $0x8] sm:$0xff] (!%p198_p10)   ;;  %vm643_vm0 = vmmov (!%p198_p10), 0   ;;  %p233_p11 = scmp.lt.s32.totalorder (!%p198_p10), %s632_s18, 1  ;;  %v559_v3 = vld [vmem:[%s809_s1 + $0x10] sm:$0xff] (!%p198_p10)  }
   0xf   : > { %201 = sbr.rel (%p198_p10) target bundleno = 264 (0x108), region = 36  ;;  %486 = vmatprep.subr.bf16.mxu0 (!%p198_p10), %v642_v1  ;;  %494 = vmatprep.mubr.msk.bf16.mxu0 (!%p198_p10), %vm643_vm0, %v642_v1  ;;  %v560_v4 = vld [vmem:[%s809_s1 + $0x18] sm:$0xff] (!%p198_p10)   ;;  %vm296_vm1 = vcmask (!%p198_p10), 523264   ;;  %s229_s22 = sand.u32 (!%p198_p10), 1, %s624_s16   ;;  %v467_v6 = vld [vmem:[%s810_s2] ss:$0 sm:$0xff] (!%p198_p10) }
  0x10   : > { %487 = vmatpush3.bf16.msra.mxu0 (!%p198_p10), %v557_v0  ;;  %s464_s24 = sshll.u32 (!%p198_p10), %s229_s22, 4  ;;  %v341_v8 = vld [vmem:[%s811_s3] sm:$0xff] (!%p198_p10)  ;;  %s480_s8 = sshll.u32 (!%p198_p10), %s632_s18, 8  ;;  %vm345_vm2 = vcmask (!%p198_p10), 261120   ;;  %v342_v12 = vld [vmem:[%s811_s3 + $0x8] sm:$0xff] (!%p198_p10) }
  0x11   : > { %488 = vmatprep.subr.bf16.mxu0 (!%p198_p10), %v642_v1  ;;  %s231_s6 = scalar_lea.vmem (!%p198_p10), [#allocation2], %s464_s24  ;;  %s644_s21 = smov (!%p198_p10), [#allocation2]  }
  0x12   : > { %s566_s24 = sshll.u32 (!%p198_p10), %s644_s21, 4  ;;  %s567_s24 = int_to_ptr.vmem [resolvable:$false] %s566_s24 }
  0x13   : > { %s568_s26 = scalar_lea.vmem (!%p198_p10), %s567_s24, 512 }
  0x14   : > { %489 = vmatpush3.bf16.msra.mxu0 (!%p198_p10), %v558_v2 }
  0x15   : > { %490 = vmatprep.subr.bf16.mxu0 (!%p198_p10), %v642_v1 }
  0x16   : > { %s234_s7 = scalar_select %p233_p11, %s632_s18, 1 }
  0x17   : > { %s762_s18 = scalar_lea.sflag [#allocation3], %s229_s22 }
  0x18   : > { %s479_s10 = sshll.u32 %s234_s7, 3  ;;  %491 = vmatpush3.bf16.msra.mxu0 %v559_v3  ;;  %s364_s7 = sshll.u32 %s231_s6, 4  ;;  %s760_s7 = int_to_ptr.vmem [resolvable:$true] %s364_s7 }
  0x19   : > { %s240_s13 = scalar_lea.vmem %s808_s0, %s479_s10  ;;  %492 = vmatprep.subr.bf16.mxu0 %v642_v1  ;;  %s562_s14 = scalar_lea.vmem %s760_s7, 256 }
  0x1a   : > { %v561_v5 = vld [vmem:[%s240_s13] sm:$0xff]   ;;  %s758_s13 = scalar_lea.hbm %s812_s4, %s480_s8  ;;  %p563_p12 = scmp.ne.s32.totalorder %s760_s7, %s562_s14 }
  0x1b   : > { %p569_p1 = scmp.lt.s32.totalorder %s760_s7, %s567_s24  ;;  %p570_p2 = scmp.lt.s32.totalorder %s568_s26, %s562_s14 }
  0x1c   : > { %493 = vmatpush3.bf16.msra.mxu0 %v560_v4  ;;  %p564_p13 = pnand %p563_p12, %p712_p4 }
  0x1d   : > { %p571_p3 = por %p570_p2, %p569_p1 }
  0x1e   : > { %p565_p0 = pneg %p564_p13 }
  0x1f   : > { %495 = vmatmul.mubr.msk.bf16.vlgmr.msra.gmra.mrb[0].mxu0 %vm296_vm1, %v561_v5 }
  0x20   : > { %p572_p5 = pnand %p571_p3, %p565_p0 }
  0xf2   : > { %v334_v7 = vpop.f32.mrb[0].mxu0 }
  0xf3   : > { %v335_v9 = vadd.f32 %v467_v6, %v334_v7  ;;  %v496_v10 = vpop.f32.mrb[1].mxu0 }
  0xf4   : > { %v337_v11 = vpop.f32.mrb[2].mxu0 }
  0xf5   : > { %v343_v13 = vadd.f32 %v341_v8, %v335_v9  ;;  %v338_v14 = vadd.f32 %v467_v6, %v337_v11  ;;  %v497_v15 = vpop.f32.mrb[3].mxu0 }
  0xf7   : > { %346 = vst.msk [vmem:[%s231_s6] sm:$0xff] %vm345_vm2, %v343_v13  ;;  %v344_v16 = vadd.f32 %v342_v12, %v338_v14 }
  0xf9   : > { %347 = vst.msk [vmem:[%s231_s6 + $0x8] sm:$0xff] %vm345_vm2, %v344_v16 }
  0xfa   : > { %575 = shalt.err (!%p572_p5)
}
  0xfb   : > { %s576_s22 = scalar_lea.hbm %s758_s13, 256  ;;  %s580_s5 = scalar_lea.hbm %s812_s4, 512 }
  0xfc   : > { %p577_p6 = scmp.ne.s32.totalorder %s758_s13, %s576_s22  ;;  %p581_p10 = scmp.lt.u32.totalorder %s758_s13, %s812_s4 }
  0xfd   : > { %p582_p11 = scmp.lt.u32.totalorder %s580_s5, %s576_s22  ;;  %p584_p13 = scmp.lt.u32.totalorder %s576_s22, %s758_s13 }
  0xfe   : > { %p578_p7 = pnand %p577_p6, %p712_p4 }
  0xff   : > { %p583_p12 = por %p582_p11, %p581_p10 }
 0x100   : > { %p579_p9 = pneg %p578_p7 }
 0x101   : > { %p585_p0 = por %p584_p13, %p583_p12 }
 0x103   : > { %p586_p1 = pnand %p585_p0, %p579_p9 }
 0x105   : > { %589 = shalt.err (!%p586_p1)
}
 0x106   : > { %s645_s9 = smov 128   ;;  %s646_s10 = smov 8  }
 0x107   : > { %498 = dma.vmem_to_hbm [thread:$0]  (%p712_p4), %s760_s7, 256, %s758_s13, %s762_s18, %s645_s9, %s645_s9, %s646_s10  }
 0x108 PF: > { %p504_p2 = scmp.ge.s32.totalorder %s640_s20, 2  ;;  %s379_s11 = sand.u32 1, %s620_s15  }
 0x109   : > { %s380_s12 = scalar_lea.sflag [#allocation3], %s379_s11 }
 0x10a   : > { %p501_p3 = pnand %p504_p2, %p719_p8 }
 0x10c   : > { %615 = dma.done.wait (!%p501_p3), %s380_s12, 256  }
 0x10d   : > { %617 = vsyncadd (!%p501_p3), %s380_s12, 4294967040  ;;  %s17_s20 = sadd.s32 1, %s640_s20   ;;  %s815_s15 = smov %s624_s16 }
 0x10e   : > { %p14_p5 = scmp.ge.s32.totalorder %s17_s20, 4   ;;  %s816_s16 = smov %s628_s17 }
 0x10f   : > { %s817_s17 = smov %s725_s28  ;;  %s818_s18 = smov %s636_s19 }
 0x110   : > { %s819_s19 = smov %s821_s23  ;;  %16 = sbr.rel (!%p14_p5) target bundleno = 4 (0x4), region = 74 }
 0x117   :  { %385 = vsyncpa [#allocation3], 1 }
 0x118   :  { %387 = vsyncpa [#allocation3 + $0x1], 1 }

</bundles_post_ra>
